<compile_context>
chip_gen: v6e
topology: v6e:2x2x1
jax: 0.10.0
libtpu: 0.0.40
codegen_flags: <defaults>
</compile_context>

<pallas_src>
import math

import jax
import jax.numpy as jnp
from jax.experimental import pallas as pl
from jax.experimental.pallas import tpu as pltpu


def _drop_path_kernel(scale_ref, x_ref, o_ref):
    # scale_ref: SMEM (B,) float32 (scalar-prefetched)
    # x_ref / o_ref: VMEM (1, TILE_R, LANES)
    b = pl.program_id(0)
    s = scale_ref[b].astype(o_ref.dtype)   # keep multiply in x's dtype
    o_ref[...] = x_ref[...] * s


def _pick_lanes(F):
    # Largest lane-dense (multiple-of-128) divisor of F from a preferred set;
    # fall back to F itself (full-dim block is exempt from the 128 rule).
    for cand in (2048, 1024, 512, 256, 128):
        if F % cand == 0:
            return cand
    return F


def _pick_tile_rows(R, lanes, itemsize, target_bytes):
    # Biggest row-tile that (a) stays under the byte budget (rounded to a
    # multiple of 8 sublanes) and (b) divides R exactly (no partial tail).
    max_rows = max(8, (target_bytes // max(1, lanes * itemsize)) // 8 * 8)
    if R <= max_rows:
        return R
    for t in range(max_rows, 0, -1):
        if R % t == 0:
            return t
    return 1  # unreachable (t=1 always divides R)


def drop_path_forward(x, key, drop_prob, training=True):
    """Pallas TPU DropPath forward, matching DropPath.forward semantics."""
    if drop_prob == 0.0 or not training:
        return x  # identity path, exactly as the PyTorch module
    assert 0.0 < drop_prob < 1.0
    keep_prob = 1.0 - drop_prob

    B = x.shape[0]
    F = math.prod(x.shape[1:])
    itemsize = jnp.dtype(x.dtype).itemsize

    # Per-sample keep/drop decision precomputed in the wrapper (tiny XLA op):
    # 0 for dropped samples, 1/keep_prob for kept samples.
    keep = jax.random.bernoulli(key, p=keep_prob, shape=(B,))
    scale = keep.astype(jnp.float32) / keep_prob            # (B,)

    # Lane-dense (B, R, LANES) view: contiguous reshape, no extra HBM pass.
    lanes = _pick_lanes(F)
    R = F // lanes
    tile_r = _pick_tile_rows(R, lanes, itemsize, target_bytes=4 << 20)
    num_row_tiles = R // tile_r                              # exact tiling
    x3 = x.reshape(B, R, lanes)

    out3 = pl.pallas_call(
        _drop_path_kernel,
        out_shape=jax.ShapeDtypeStruct((B, R, lanes), x.dtype),
        grid_spec=pltpu.PrefetchScalarGridSpec(
            num_scalar_prefetch=1,
            grid=(B, num_row_tiles),
            in_specs=[pl.BlockSpec((1, tile_r, lanes),
                                   lambda b, t, scale: (b, t, 0))],
            out_specs=pl.BlockSpec((1, tile_r, lanes),
                                   lambda b, t, scale: (b, t, 0)),
        ),
        compiler_params=pltpu.CompilerParams(
            dimension_semantics=("parallel", "parallel"),
            vmem_limit_bytes=32 << 20,
        ),
        cost_estimate=pl.CostEstimate(
            flops=B * F,
            transcendentals=0,
            bytes_accessed=2 * B * F * itemsize,
        ),
    )(scale, x3)
    return out3.reshape(x.shape)


if __name__ == "__main__":
    # Small shapes consistent with Swin usage: DropPath acts on (B, L, C)
    # token tensors. batch=2, seq=8, hidden=32.
    B, L, C = 2, 8, 32
    drop_prob = 0.25
    keep_prob = 1.0 - drop_prob

    key = jax.random.PRNGKey(0)
    kx, kd = jax.random.split(key)
    x = jax.random.normal(kx, (B, L, C), dtype=jnp.float32)

    # Eval mode / drop_prob == 0 are exact identities (no kernel launch),
    # matching the PyTorch forward.
    out_eval = drop_path_forward(x, kd, drop_prob, training=False)
    assert jnp.array_equal(out_eval, x)
    out_p0 = drop_path_forward(x, kd, 0.0, training=True)
    assert jnp.array_equal(out_p0, x)

    # Training path: per-sample stochastic depth via the Pallas kernel.
    out = drop_path_forward(x, kd, drop_prob, training=True)
    out = jax.block_until_ready(out)
    assert out.shape == x.shape
    assert out.dtype == x.dtype

    # Each sample must be either fully dropped (all zeros) or scaled by
    # exactly 1/keep_prob; this verifies the per-sample mask + rescale
    # semantics without depending on the exact PRNG stream.
    for b in range(B):
        dropped = bool(jnp.all(out[b] == 0.0))
        kept = bool(jnp.allclose(out[b], x[b] / keep_prob, atol=1e-5, rtol=1e-5))
        assert dropped or kept, f"sample {b}: not a valid DropPath output"

    # Exercise a multi-row-tile case as well (still small): (2, 64, 256).
    x2 = jax.random.normal(kx, (2, 64, 256), dtype=jnp.float32)
    out2 = jax.block_until_ready(drop_path_forward(x2, kd, drop_prob, True))
    for b in range(2):
        dropped = bool(jnp.all(out2[b] == 0.0))
        kept = bool(jnp.allclose(out2[b], x2[b] / keep_prob, atol=1e-5, rtol=1e-5))
        assert dropped or kept, f"sample {b}: not a valid DropPath output"

    print("KERNEL_OK")
</pallas_src>

<mosaic_0001>
module attributes {stable_mosaic.version = 11 : i64} {
  func.func @_drop_path_kernel(%arg0: i32, %arg1: i32, %arg2: memref<2xf32, #tpu.memory_space<smem>>, %arg3: memref<1x1x256xf32, #tpu.memory_space<vmem>>, %arg4: memref<1x1x256xf32, #tpu.memory_space<vmem>>) attributes {dimension_semantics = [#tpu.dimension_semantics<parallel>, #tpu.dimension_semantics<parallel>], iteration_bounds = array<i64: 2, 1>, scalar_prefetch = 1 : i64, scratch_operands = 0 : i64, tpu.core_type = #tpu.core_type<tc>, window_params = [{transform_indices = @transform_0, window_bounds = array<i64: 1, 1, 256>}, {transform_indices = @transform_1, window_bounds = array<i64: 1, 1, 256>}]} {
    %0 = arith.index_cast %arg0 : i32 to index
    %1 = memref.load %arg2[%0] : memref<2xf32, #tpu.memory_space<smem>>
    %c0 = arith.constant 0 : index
    %c0_0 = arith.constant 0 : index
    %c0_1 = arith.constant 0 : index
    %2 = vector.load %arg3[%c0, %c0_0, %c0_1] : memref<1x1x256xf32, #tpu.memory_space<vmem>>, vector<1x1x256xf32>
    %3 = vector.broadcast %1 : f32 to vector<1x1x256xf32>
    %4 = arith.mulf %2, %3 : vector<1x1x256xf32>
    %c0_2 = arith.constant 0 : index
    %c0_3 = arith.constant 0 : index
    %c0_4 = arith.constant 0 : index
    %5 = vector.load %arg4[%c0_2, %c0_3, %c0_4] : memref<1x1x256xf32, #tpu.memory_space<vmem>>, vector<1x1x256xf32>
    tpu.vector_store %arg4[%c0_2, %c0_3, %c0_4], %4 {strides = array<i32>} : memref<1x1x256xf32, #tpu.memory_space<vmem>>, vector<1x1x256xf32>,
    return
  }
  func.func @transform_0(%arg0: i32, %arg1: i32, %arg2: memref<2xf32, #tpu.memory_space<smem>>) -> (i32, i32, i32) {
    %c0_i32 = arith.constant 0 : i32
    %c0_i32_0 = arith.constant 0 : i32
    return %arg0, %arg1, %c0_i32 : i32, i32, i32
  }
  func.func @transform_1(%arg0: i32, %arg1: i32, %arg2: memref<2xf32, #tpu.memory_space<smem>>) -> (i32, i32, i32) {
    %c0_i32 = arith.constant 0 : i32
    %c0_i32_0 = arith.constant 0 : i32
    return %arg0, %arg1, %c0_i32 : i32, i32, i32
  }
}

</mosaic_0001>

<bundles_post_ra>
// kernel: tpu_custom_call.1
= control target key start
LH: loop header
LB: loop body
LE: loop exit
PB: predicated region body
PF: predicated region fallthrough
CT: control target
= control target key end

     0   :  { %s466_s9 = smov [#allocation3]   ;;  %s622_s0 = inlined_call_operand.hbm [shape: f32[2], index: 0, kind: input, shape index: {}]   ;;  %s623_s1 = inlined_call_operand.hbm [shape: f32[2,1,256], index: 1, kind: input, shape index: {}]   ;;  %s624_s2 = inlined_call_operand.hbm [shape: f32[2,1,256], index: 2, kind: output, shape index: {}]  }
   0x1   :  { %8 = dma.hbm_to_smem %s622_s0, 16, %s466_s9, [#allocation2] }
   0x2   :  { %432 = dma.done.wait [#allocation2], 16 }
   0x3   :  { %433 = vsyncadd [#allocation2], 4294967280 }
   0x4   :  { %10 = sfence }
   0x5   :  { %11 = vsyncpa [#allocation5], 0 }
   0x6   :  { %13 = vsyncpa [#allocation5 + $0x1], 0 }
   0x7   :  { %14 = vsyncpa [#allocation6], 0 }
   0x8   :  { %16 = vsyncpa [#allocation6 + $0x1], 0  ;;  %s487_s12 = smov 0   ;;  %s489_s13 = smov 0  }
   0x9   :  { %s491_s14 = smov 0   ;;  %s493_s15 = smov 0  }
   0xa   :  { %s495_s16 = smov 0   ;;  %s497_s17 = smov 0  }
   0xb LB: > { %s266_s0 = sadd.s32 4294967295, %s464_s17   ;;  %s267_s18 = sadd.s32 4294967294, %s464_s17   ;;  %s464_s17 = sphi %s497_s17, %s22_s17   ;;  %s460_s16 = sphi %s495_s16, %s636_s16   ;;  %s456_s15 = sphi %s493_s15, %s635_s15   ;;  %s452_s14 = sphi %s491_s14, %s634_s14   ;;  %s448_s13 = sphi %s489_s13, %s633_s13   ;;  %s444_s12 = sphi %s487_s12, %s632_s12  }
   0xc   : > { %s34_s19 = sadd.s32 1, %s460_s16  ;;  %s43_s20 = sadd.s32 1, %s452_s14 }
   0xd   : > { %p36_p0 = scmp.ge.s32.totalorder %s34_s19, 2  ;;  %p50_p1 = scmp.ne.s32.totalorder %s452_s14, %s448_s13 }
   0xe   : > { %p51_p2 = scmp.eq.s32.totalorder %s464_s17, 0  ;;  %p56_p3 = scmp.ne.s32.totalorder %s448_s13, %s444_s12 }
   0xf   : > { %s638_s19 = smov (%p36_p0, %s34_s19), 0  ;;  %p57_p5 = scmp.eq.s32.totalorder %s266_s0, 0 }
  0x10   : > { %p528_p4 = por %p51_p2, %p50_p1  ;;  %s38_s22 = ssub.s32 %s460_s16, %s638_s19 }
  0x11   : > { %p82_p6 = scmp.eq.s32.totalorder %s266_s0, 1  ;;  %p41_p7 = scmp.eq.s32.totalorder %s38_s22, 0 }
  0x12   : > { %p534_p8 = por %p57_p5, %p56_p3  ;;  %p88_p10 = scmp.eq.s32.totalorder %s267_s18, 1 }
  0x13   : > { %p538_p9 = por %p82_p6, %p50_p1  ;;  %p295_p13 = scmp.lt.s32.totalorder %s464_s17, 2 }
  0x14   : > { %s543_s25 = scalar_select %p41_p7, %s452_s14, %s43_s20  }
  0x15   : > { %p545_p11 = por %p88_p10, %p56_p3  ;;  %s108_s27 = sand.u32 1, %s452_s14  }
  0x16   : > { %s270_s28 = sshll.u32 %s108_s27, 1  ;;  %s281_s29 = sshll.u32 %s460_s16, 5 }
  0x17   : > { %s628_s26 = scalar_select %p545_p11, 1, 0 }
  0x18   : > { %s120_s4 = scalar_lea.hbm %s623_s1, %s281_s29  ;;  %s112_s5 = scalar_lea.vmem [#allocation4], %s270_s28 }
  0x19   : > { %s122_s6 = sshll.u32 %s112_s5, 4  ;;  %p558_p0 = pnand %p295_p13, %p528_p4  ;;  %s123_s6 = int_to_ptr.vmem [resolvable:$true] %s122_s6 }
  0x1a   : > { %p273_p1 = scmp.ge.s32.totalorder %s464_s17, 1  ;;  %p127_p2 = scmp.lt.s32.totalorder %s464_s17, 3 }
  0x1b   : > { %s109_s8 = scalar_lea.sflag [#allocation5], %s108_s27  ;;  %p356_p3 = pneg %p558_p0 }
  0x1c   : > { %s367_s9 = scalar_lea.vmem %s123_s6, 32  ;;  %s467_s10 = smov [#allocation4]  }
  0x1d   : > { %p368_p5 = scmp.ne.s32.totalorder %s123_s6, %s367_s9  ;;  %s372_s11 = sshll.u32 %s467_s10, 4  ;;  %s373_s11 = int_to_ptr.vmem [resolvable:$false] %s372_s11 }
  0x1e   : > { %s374_s0 = scalar_lea.vmem %s373_s11, 64  ;;  %p375_p10 = scmp.lt.s32.totalorder %s123_s6, %s373_s11 }
  0x1f   : > { %p370_p6 = pnand %p368_p5, %p356_p3  ;;  %p376_p12 = scmp.lt.s32.totalorder %s374_s0, %s367_s9 }
  0x21   : > { %p371_p7 = pneg %p370_p6  ;;  %p377_p4 = por %p376_p12, %p375_p10 }
  0x23   : > { %p378_p13 = pnand %p377_p4, %p371_p7 }
  0x25   : > { %381 = shalt.err (!%p378_p13)
}
  0x26   : > { %290 = dma.hbm_to_vmem [thread:$0]  (!%p558_p0), %s120_s4, 32, %s123_s6, %s109_s8  }
  0x27   : > { %p128_p11 = pnand %p273_p1, %p127_p2 }
  0x28   : > { %s573_s18 = sand.u32 (!%p128_p11), 1, %s448_s13  }
  0x29   : > { %131 = sbr.rel (%p128_p11) target bundleno = 71 (0x47), region = 24  ;;  %s274_s20 = sshll.u32 (!%p128_p11), %s573_s18, 1 }
  0x2a   : > { %s134_s21 = scalar_lea.sflag (!%p128_p11), [#allocation5], %s573_s18  ;;  %s137_s22 = scalar_lea.vmem (!%p128_p11), [#allocation4], %s274_s20 }
  0x2e   : > { %435 = dma.done.wait (%p534_p8), %s134_s21, 32  }
  0x2f   : > { %437 = vsyncadd (%p534_p8), %s134_s21, 4294967264  ;;  %s156_s27 = sld [smem:[#allocation3 + %s456_s15]]  ;;  %v160_v0 = vlaneseq  ;;  %s155_s28 = scalar_lea.vmem [#allocation7], %s274_s20  ;;  %v157_v1 = vld [vmem:[%s137_s22] sm:$0x3] }
  0x30   : > { %s182_s29 = sshll.u32 %s155_s28, 4  ;;  %s282_s30 = sshll.u32 %s456_s15, 5  ;;  %s183_s29 = int_to_ptr.vmem [resolvable:$true] %s182_s29 }
  0x31   : > { %vm162_vm0 = vcmp.lt.s32.totalorder %v160_v0, 256  ;;  %s180_s5 = scalar_lea.hbm %s624_s2, %s282_s30  ;;  %s166_s23 = scalar_lea.sflag [#allocation6], %s573_s18 }
  0x32   : > { %s382_s6 = scalar_lea.vmem %s183_s29, 32  ;;  %s468_s7 = smov [#allocation7]  }
  0x33   : > { %p383_p8 = scmp.ne.s32.totalorder %s183_s29, %s382_s6  ;;  %s386_s8 = sshll.u32 %s468_s7, 4  ;;  %s387_s8 = int_to_ptr.vmem [resolvable:$false] %s386_s8 }
  0x34   : > { %s388_s15 = scalar_lea.vmem %s387_s8, 64  ;;  %p389_p0 = scmp.lt.s32.totalorder %s183_s29, %s387_s8 }
  0x35   : > { %v158_v2 = vstv %s156_s27  ;;  %p384_p11 = pnand %p383_p8, %p538_p9  ;;  %p390_p1 = scmp.lt.s32.totalorder %s388_s15, %s382_s6 }
  0x36   : > { %v159_v3 = vmul.f32 %v158_v2, %v157_v1 }
  0x37   : > { %p385_p12 = pneg %p384_p11  ;;  %p391_p2 = por %p390_p1, %p389_p0 }
  0x38   : > { %164 = vst.msk [vmem:[%s155_s28] sm:$0x3] %vm162_vm0, %v159_v3 }
  0x39   : > { %p392_p3 = pnand %p391_p2, %p385_p12 }
  0x3b   : > { %395 = shalt.err (!%p392_p3)
}
  0x3c   : > { %s396_s9 = scalar_lea.hbm %s180_s5, 32  ;;  %s400_s0 = scalar_lea.hbm %s624_s2, 64 }
  0x3d   : > { %p397_p5 = scmp.ne.s32.totalorder %s180_s5, %s396_s9  ;;  %p401_p10 = scmp.lt.s32.totalorder %s180_s5, %s624_s2 }
  0x3e   : > { %p402_p4 = scmp.lt.s32.totalorder %s400_s0, %s396_s9 }
  0x3f   : > { %p398_p6 = pnand %p397_p5, %p538_p9 }
  0x40   : > { %p403_p13 = por %p402_p4, %p401_p10 }
  0x41   : > { %p399_p7 = pneg %p398_p6 }
  0x43   : > { %p404_p8 = pnand %p403_p13, %p399_p7 }
  0x45   : > { %407 = shalt.err (!%p404_p8)
}
  0x46   : > { %285 = dma.vmem_to_hbm [thread:$0]  (%p538_p9), %s183_s29, 32, %s180_s5, %s166_s23  }
  0x47 PF: > { %s194_s21 = sand.u32 1, %s444_s12   ;;  %p630_p11 = scmp.ne.s32.totalorder %s628_s26, 0 }
  0x48   : > { %p631_p12 = scmp.ge.s32.totalorder %s464_s17, 2  ;;  %s195_s22 = scalar_lea.sflag [#allocation6], %s194_s21 }
  0x4a   : > { %p292_p0 = pnand %p631_p12, %p630_p11 }
  0x4c   : > { %p293_p1 = pneg %p292_p0 }
  0x4e   : > { %439 = dma.done.wait (%p293_p1), %s195_s22, 32  }
  0x4f   : > { %441 = vsyncadd (%p293_p1), %s195_s22, 4294967264  ;;  %s22_s17 = sadd.s32 1, %s464_s17   ;;  %s632_s12 = smov %s448_s13 }
  0x50   : > { %p19_p2 = scmp.ge.s32.totalorder %s22_s17, 4   ;;  %s633_s13 = smov %s452_s14 }
  0x51   : > { %s634_s14 = smov %s543_s25  ;;  %s635_s15 = smov %s460_s16 }
  0x52   : > { %s636_s16 = smov %s638_s19  ;;  %21 = sbr.rel (!%p19_p2) target bundleno = 11 (0xb), region = 69 }
  0x57   :  { %200 = vsyncpa [#allocation5], 1 }
  0x58   :  { %202 = vsyncpa [#allocation5 + $0x1], 1 }
  0x59   :  { %203 = vsyncpa [#allocation6], 1 }
  0x5a   :  { %205 = vsyncpa [#allocation6 + $0x1], 1 }

</bundles_post_ra>
